<compile_context>
chip_gen: v5e
topology: v5e:2x2
jax: 0.10.0
libtpu: 0.0.40
codegen_flags: <defaults>
</compile_context>

<pallas_src>
import functools

import jax
import jax.numpy as jnp
import numpy as np
from jax.experimental import pallas as pl
from jax.experimental.pallas import tpu as pltpu  # noqa: F401  (TPU backend)

NEG_INF = jnp.float32(-1e30)
LEAKY_SLOPE = 0.01  # F.leaky_relu default (the module uses F.leaky_relu, not DGL's 0.2)


# ----------------------------- Pallas kernel ------------------------------- #

def _attend(e_dst_col, e_src_row, bias, z):
    """Masked GAT attention + aggregation for one head.

    e_dst_col : (n_dst, 1)     per-dst attention term
    e_src_row : (1, n_src)     per-src attention term
    bias      : (n_dst, n_src) additive mask bias (0 where edge, -1e30 else)
    z         : (n_src, d)     source values
    returns   : (n_dst, d)
    """
    logits = e_dst_col + e_src_row                       # (n_dst, n_src)
    logits = jnp.where(logits > 0, logits, LEAKY_SLOPE * logits)   # leaky_relu
    logits = logits + bias
    m = jnp.max(logits, axis=-1, keepdims=True)
    p = jnp.exp(logits - m)                              # masked entries underflow to 0
    denom = jnp.sum(p, axis=-1, keepdims=True)
    inv = 1.0 / jnp.maximum(denom, jnp.float32(1e-30))   # guard: fully-masked dst rows
    # normalize after the matmul: (p @ z) * (1/l) == softmax(p) @ z
    return jnp.dot(p, z, preferred_element_type=jnp.float32) * inv


def _gat_fused_kernel(feats_ref, w1_ref, bias0_ref, w2_ref, bias1_ref, out_ref,
                      *, num_heads, hidden_dim, out_dim, n_dst0, n_dst1):
    """Fused 2-layer GAT forward.

    feats_ref : (n_src0, in_dim)
    w1_ref    : (in_dim, H*hid + 2H)   [z_head0..z_headH | e_src cols | e_dst cols]
    bias0_ref : (n_dst0, n_src0)       additive edge-mask bias, block 0
    w2_ref    : (H*hid, out_dim + 2)   [z | e_src col | e_dst col]
    bias1_ref : (n_dst1, n_dst0)       additive edge-mask bias, block 1
    out_ref   : (n_dst1, out_dim)
    """
    hh = num_heads * hidden_dim

    # ---------------- layer 1 : num_heads heads, merge='cat' --------------- #
    h = feats_ref[...]                                                 # (n_src0, in_dim)
    z_all = jnp.dot(h, w1_ref[...], preferred_element_type=jnp.float32)  # (n_src0, hh+2H)
    z1 = z_all[:, :hh]                                                 # (n_src0, H*hid)
    e_src_rows = z_all[:, hh:hh + num_heads].T                         # (H, n_src0)  one transpose for all heads
    e_dst_cols = z_all[:n_dst0, hh + num_heads:hh + 2 * num_heads]     # (n_dst0, H)

    bias0 = bias0_ref[...]
    head_outs = []
    for hd in range(num_heads):                                        # unrolled at trace time
        z_h = z1[:, hd * hidden_dim:(hd + 1) * hidden_dim]             # (n_src0, hid)
        head_outs.append(_attend(e_dst_cols[:, hd:hd + 1],
                                 e_src_rows[hd:hd + 1, :],
                                 bias0, z_h))
    h1 = jnp.concatenate(head_outs, axis=1)                            # (n_dst0, H*hid), lane-dense

    # ELU between layers (EUP exp)
    h1 = jnp.where(h1 > 0, h1, jnp.exp(h1) - 1.0)

    # ---------------------- layer 2 : single head -------------------------- #
    z2_all = jnp.dot(h1, w2_ref[...], preferred_element_type=jnp.float32)  # (n_dst0, out_dim+2)
    z2 = z2_all[:, :out_dim]
    e_src2_row = z2_all[:, out_dim:out_dim + 1].T                      # (1, n_dst0)
    e_dst2_col = z2_all[:n_dst1, out_dim + 1:out_dim + 2]              # (n_dst1, 1)

    out_ref[...] = _attend(e_dst2_col, e_src2_row, bias1_ref[...], z2)


# ------------------------------ JAX wrapper -------------------------------- #

def _augment_weights(head_params):
    """Fold per-head fc + attention weights into one augmented matrix.

    head_params: list of (fc_w (out_dim, in_dim) torch layout,
                          attn_w (1, 2*out_dim) torch layout)
    returns (in_dim, H*out_dim + 2H):
      columns [0 : H*out_dim]           -> z for each head (head h contiguous)
      columns [H*out_dim + h]           -> e_src column for head h  (= W^T a_src)
      columns [H*out_dim + H + h]       -> e_dst column for head h  (= W^T a_dst)
    """
    z_cols, esrc_cols, edst_cols = [], [], []
    for fc_w, attn_w in head_params:
        out_dim = fc_w.shape[0]
        wt = fc_w.T.astype(jnp.float32)                      # (in_dim, out_dim)
        a = attn_w.reshape(-1).astype(jnp.float32)           # (2*out_dim,)
        z_cols.append(wt)
        esrc_cols.append(wt @ a[:out_dim][:, None])          # (in_dim, 1)
        edst_cols.append(wt @ a[out_dim:][:, None])          # (in_dim, 1)
    return jnp.concatenate(z_cols + esrc_cols + edst_cols, axis=1)


def gat_forward(params, feats, mask0, mask1, n_dst0, n_dst1):
    """Full GAT.forward (use_residual=False). One fused pallas_call."""
    layer1 = params["layer1"]
    (w2, a2), = params["layer2"]
    num_heads = len(layer1)
    hidden_dim = layer1[0][0].shape[0]
    out_dim = w2.shape[0]

    w1_aug = _augment_weights(layer1)                        # (in_dim, H*hid + 2H)
    w2_aug = _augment_weights([(w2, a2)])                    # (H*hid, out_dim + 2)

    # additive mask bias (0 where edge exists, -1e30 otherwise), computed once
    bias0 = jnp.where(mask0 > 0, 0.0, NEG_INF).astype(jnp.float32)
    bias1 = jnp.where(mask1 > 0, 0.0, NEG_INF).astype(jnp.float32)

    kernel = functools.partial(
        _gat_fused_kernel,
        num_heads=num_heads, hidden_dim=hidden_dim, out_dim=out_dim,
        n_dst0=n_dst0, n_dst1=n_dst1)

    # Whole arrays fit trivially in VMEM -> no grid, default whole-array blocks.
    # TODO(synk): for large graphs, tile (dst, src) flash-attention style with a
    # grid and online softmax; dense O(N^2) masks won't fit VMEM past a few K nodes.
    return pl.pallas_call(
        kernel,
        out_shape=jax.ShapeDtypeStruct((n_dst1, out_dim), jnp.float32),
    )(feats.astype(jnp.float32), w1_aug, bias0, w2_aug, bias1)


# --------------------------- reference (pure JAX) --------------------------- #

def _ref_head(h, fc_w, attn_w, mask, n_dst):
    z = h @ fc_w.T
    out_dim = fc_w.shape[0]
    a = attn_w.reshape(-1)
    e = (z[:n_dst] @ a[out_dim:])[:, None] + (z @ a[:out_dim])[None, :]
    e = jnp.where(e > 0, e, LEAKY_SLOPE * e)
    e = jnp.where(mask > 0, e, -1e30)
    p = jnp.exp(e - jnp.max(e, axis=-1, keepdims=True))
    p = jnp.where(mask > 0, p, 0.0)
    alpha = p / jnp.sum(p, axis=-1, keepdims=True)
    return alpha @ z


def _ref_forward(params, feats, mask0, mask1, n_dst0, n_dst1):
    hs = [_ref_head(feats, w, a, mask0, n_dst0) for (w, a) in params["layer1"]]
    h = jnp.concatenate(hs, axis=1)
    h = jnp.where(h > 0, h, jnp.exp(h) - 1.0)
    (w2, a2), = params["layer2"]
    return _ref_head(h, w2, a2, mask1, n_dst1)


# ----------------------------------- main ----------------------------------- #

def _xavier_normal(key, shape, gain):
    fan_out, fan_in = shape
    std = gain * np.sqrt(2.0 / (fan_in + fan_out))
    return jax.random.normal(key, shape, dtype=jnp.float32) * std


if __name__ == "__main__":
    # Small shapes consistent with the module
    in_dim, hidden_dim, out_dim, num_heads = 32, 8, 16, 4
    n_src0, n_dst0, n_dst1 = 16, 12, 8          # block0: 16->12, block1: 12->8

    key = jax.random.PRNGKey(0)
    keys = jax.random.split(key, 16)
    gain = np.sqrt(2.0)                          # nn.init.calculate_gain('relu')

    # layer1: num_heads independent GATLayer(in_dim, hidden_dim)
    layer1 = []
    for i in range(num_heads):
        fc_w = _xavier_normal(keys[2 * i], (hidden_dim, in_dim), gain)
        attn_w = _xavier_normal(keys[2 * i + 1], (1, 2 * hidden_dim), gain)
        layer1.append((fc_w, attn_w))
    # layer2: single GATLayer(hidden_dim * num_heads, out_dim)
    fc_w2 = _xavier_normal(keys[10], (out_dim, hidden_dim * num_heads), gain)
    attn_w2 = _xavier_normal(keys[11], (1, 2 * out_dim), gain)
    params = {"layer1": layer1, "layer2": [(fc_w2, attn_w2)]}

    # node features and block edge masks (self-loops guarantee non-empty mailboxes)
    feats = jax.random.normal(keys[12], (n_src0, in_dim), dtype=jnp.float32)
    m0 = (jax.random.uniform(keys[13], (n_dst0, n_src0)) < 0.4).astype(jnp.float32)
    m1 = (jax.random.uniform(keys[14], (n_dst1, n_dst0)) < 0.4).astype(jnp.float32)
    m0 = jnp.maximum(m0, jnp.eye(n_dst0, n_src0, dtype=jnp.float32))
    m1 = jnp.maximum(m1, jnp.eye(n_dst1, n_dst0, dtype=jnp.float32))

    out = gat_forward(params, feats, m0, m1, n_dst0, n_dst1)
    out = jax.block_until_ready(out)

    ref = _ref_forward(params, feats, m0, m1, n_dst0, n_dst1)
    np.testing.assert_allclose(np.asarray(out), np.asarray(ref), rtol=1e-5, atol=1e-5)
    assert out.shape == (n_dst1, out_dim)

    print("KERNEL_OK")
</pallas_src>

<mosaic_0001>
module attributes {stable_mosaic.version = 11 : i64} {
  func.func @_gat_fused_kernel(%arg0: memref<16x32xf32, #tpu.memory_space<vmem>>, %arg1: memref<32x40xf32, #tpu.memory_space<vmem>>, %arg2: memref<12x16xf32, #tpu.memory_space<vmem>>, %arg3: memref<32x18xf32, #tpu.memory_space<vmem>>, %arg4: memref<8x12xf32, #tpu.memory_space<vmem>>, %arg5: memref<8x16xf32, #tpu.memory_space<vmem>>) attributes {dimension_semantics = [], scalar_prefetch = 0 : i64, scratch_operands = 0 : i64, tpu.core_type = #tpu.core_type<tc>} {
    %c0 = arith.constant 0 : index
    %c0_0 = arith.constant 0 : index
    %0 = vector.load %arg0[%c0, %c0_0] : memref<16x32xf32, #tpu.memory_space<vmem>>, vector<16x32xf32>
    %c0_1 = arith.constant 0 : index
    %c0_2 = arith.constant 0 : index
    %1 = vector.load %arg1[%c0_1, %c0_2] : memref<32x40xf32, #tpu.memory_space<vmem>>, vector<32x40xf32>
    %cst = arith.constant dense<0.000000e+00> : vector<16x40xf32>
    %2 = tpu.matmul %0, %1, %cst {dimension_numbers = #tpu.dot_dimension_numbers<[1], [0], [0], [1], [0, 0, 1, 1], [], []>} : vector<16x32xf32>, vector<32x40xf32>, vector<16x40xf32> -> vector<16x40xf32>
    %3 = vector.extract_strided_slice %2 {offsets = [0, 0], sizes = [16, 32], strides = [1, 1]} : vector<16x40xf32> to vector<16x32xf32>
    %4 = vector.extract_strided_slice %2 {offsets = [0, 32], sizes = [16, 4], strides = [1, 1]} : vector<16x40xf32> to vector<16x4xf32>
    %5 = tpu.transpose %4, [1, 0] : vector<16x4xf32> -> vector<4x16xf32>
    %6 = vector.extract_strided_slice %2 {offsets = [0, 36], sizes = [12, 4], strides = [1, 1]} : vector<16x40xf32> to vector<12x4xf32>
    %c0_3 = arith.constant 0 : index
    %c0_4 = arith.constant 0 : index
    %7 = vector.load %arg2[%c0_3, %c0_4] : memref<12x16xf32, #tpu.memory_space<vmem>>, vector<12x16xf32>
    %8 = vector.extract_strided_slice %3 {offsets = [0, 0], sizes = [16, 8], strides = [1, 1]} : vector<16x32xf32> to vector<16x8xf32>
    %9 = vector.extract_strided_slice %6 {offsets = [0, 0], sizes = [12, 1], strides = [1, 1]} : vector<12x4xf32> to vector<12x1xf32>
    %10 = vector.extract_strided_slice %5 {offsets = [0, 0], sizes = [1, 16], strides = [1, 1]} : vector<4x16xf32> to vector<1x16xf32>
    %11 = vector.broadcast %9 : vector<12x1xf32> to vector<12x16xf32>
    %12 = vector.broadcast %10 : vector<1x16xf32> to vector<12x16xf32>
    %13 = arith.addf %11, %12 : vector<12x16xf32>
    %cst_5 = arith.constant 0.000000e+00 : f32
    %14 = vector.broadcast %cst_5 : f32 to vector<12x16xf32>
    %15 = arith.cmpf ogt, %13, %14 : vector<12x16xf32>
    %cst_6 = arith.constant 0.00999999977 : f32
    %16 = vector.broadcast %cst_6 : f32 to vector<12x16xf32>
    %17 = arith.mulf %16, %13 : vector<12x16xf32>
    %18 = arith.select %15, %13, %17 : vector<12x16xi1>, vector<12x16xf32>
    %19 = arith.addf %18, %7 : vector<12x16xf32>
    %cst_7 = arith.constant dense<0xFF800000> : vector<12xf32>
    %20 = vector.multi_reduction <maximumf>, %19, %cst_7 [1] : vector<12x16xf32> to vector<12xf32>
    %21 = vector.shape_cast %20 : vector<12xf32> to vector<12x1xf32>
    %22 = vector.broadcast %21 : vector<12x1xf32> to vector<12x16xf32>
    %23 = arith.subf %19, %22 : vector<12x16xf32>
    %24 = math.exp %23 : vector<12x16xf32>
    %cst_8 = arith.constant dense<0.000000e+00> : vector<12xf32>
    %25 = vector.multi_reduction <add>, %24, %cst_8 [1] : vector<12x16xf32> to vector<12xf32>
    %26 = vector.shape_cast %25 : vector<12xf32> to vector<12x1xf32>
    %cst_9 = arith.constant 1.000000e-30 : f32
    %27 = vector.broadcast %cst_9 : f32 to vector<12x1xf32>
    %28 = arith.maximumf %26, %27 : vector<12x1xf32>
    %cst_10 = arith.constant 1.000000e+00 : f32
    %29 = vector.broadcast %cst_10 : f32 to vector<12x1xf32>
    %30 = arith.divf %29, %28 : vector<12x1xf32>
    %cst_11 = arith.constant dense<0.000000e+00> : vector<12x8xf32>
    %31 = tpu.matmul %24, %8, %cst_11 {dimension_numbers = #tpu.dot_dimension_numbers<[1], [0], [0], [1], [0, 0, 1, 1], [], []>} : vector<12x16xf32>, vector<16x8xf32>, vector<12x8xf32> -> vector<12x8xf32>
    %32 = vector.broadcast %30 : vector<12x1xf32> to vector<12x8xf32>
    %33 = arith.mulf %31, %32 : vector<12x8xf32>
    %34 = vector.extract_strided_slice %3 {offsets = [0, 8], sizes = [16, 8], strides = [1, 1]} : vector<16x32xf32> to vector<16x8xf32>
    %35 = vector.extract_strided_slice %6 {offsets = [0, 1], sizes = [12, 1], strides = [1, 1]} : vector<12x4xf32> to vector<12x1xf32>
    %36 = vector.extract_strided_slice %5 {offsets = [1, 0], sizes = [1, 16], strides = [1, 1]} : vector<4x16xf32> to vector<1x16xf32>
    %37 = vector.broadcast %35 : vector<12x1xf32> to vector<12x16xf32>
    %38 = vector.broadcast %36 : vector<1x16xf32> to vector<12x16xf32>
    %39 = arith.addf %37, %38 : vector<12x16xf32>
    %cst_12 = arith.constant 0.000000e+00 : f32
    %40 = vector.broadcast %cst_12 : f32 to vector<12x16xf32>
    %41 = arith.cmpf ogt, %39, %40 : vector<12x16xf32>
    %cst_13 = arith.constant 0.00999999977 : f32
    %42 = vector.broadcast %cst_13 : f32 to vector<12x16xf32>
    %43 = arith.mulf %42, %39 : vector<12x16xf32>
    %44 = arith.select %41, %39, %43 : vector<12x16xi1>, vector<12x16xf32>
    %45 = arith.addf %44, %7 : vector<12x16xf32>
    %cst_14 = arith.constant dense<0xFF800000> : vector<12xf32>
    %46 = vector.multi_reduction <maximumf>, %45, %cst_14 [1] : vector<12x16xf32> to vector<12xf32>
    %47 = vector.shape_cast %46 : vector<12xf32> to vector<12x1xf32>
    %48 = vector.broadcast %47 : vector<12x1xf32> to vector<12x16xf32>
    %49 = arith.subf %45, %48 : vector<12x16xf32>
    %50 = math.exp %49 : vector<12x16xf32>
    %cst_15 = arith.constant dense<0.000000e+00> : vector<12xf32>
    %51 = vector.multi_reduction <add>, %50, %cst_15 [1] : vector<12x16xf32> to vector<12xf32>
    %52 = vector.shape_cast %51 : vector<12xf32> to vector<12x1xf32>
    %cst_16 = arith.constant 1.000000e-30 : f32
    %53 = vector.broadcast %cst_16 : f32 to vector<12x1xf32>
    %54 = arith.maximumf %52, %53 : vector<12x1xf32>
    %cst_17 = arith.constant 1.000000e+00 : f32
    %55 = vector.broadcast %cst_17 : f32 to vector<12x1xf32>
    %56 = arith.divf %55, %54 : vector<12x1xf32>
    %cst_18 = arith.constant dense<0.000000e+00> : vector<12x8xf32>
    %57 = tpu.matmul %50, %34, %cst_18 {dimension_numbers = #tpu.dot_dimension_numbers<[1], [0], [0], [1], [0, 0, 1, 1], [], []>} : vector<12x16xf32>, vector<16x8xf32>, vector<12x8xf32> -> vector<12x8xf32>
    %58 = vector.broadcast %56 : vector<12x1xf32> to vector<12x8xf32>
    %59 = arith.mulf %57, %58 : vector<12x8xf32>
    %60 = vector.extract_strided_slice %3 {offsets = [0, 16], sizes = [16, 8], strides = [1, 1]} : vector<16x32xf32> to vector<16x8xf32>
    %61 = vector.extract_strided_slice %6 {offsets = [0, 2], sizes = [12, 1], strides = [1, 1]} : vector<12x4xf32> to vector<12x1xf32>
    %62 = vector.extract_strided_slice %5 {offsets = [2, 0], sizes = [1, 16], strides = [1, 1]} : vector<4x16xf32> to vector<1x16xf32>
    %63 = vector.broadcast %61 : vector<12x1xf32> to vector<12x16xf32>
    %64 = vector.broadcast %62 : vector<1x16xf32> to vector<12x16xf32>
    %65 = arith.addf %63, %64 : vector<12x16xf32>
    %cst_19 = arith.constant 0.000000e+00 : f32
    %66 = vector.broadcast %cst_19 : f32 to vector<12x16xf32>
    %67 = arith.cmpf ogt, %65, %66 : vector<12x16xf32>
    %cst_20 = arith.constant 0.00999999977 : f32
    %68 = vector.broadcast %cst_20 : f32 to vector<12x16xf32>
    %69 = arith.mulf %68, %65 : vector<12x16xf32>
    %70 = arith.select %67, %65, %69 : vector<12x16xi1>, vector<12x16xf32>
    %71 = arith.addf %70, %7 : vector<12x16xf32>
    %cst_21 = arith.constant dense<0xFF800000> : vector<12xf32>
    %72 = vector.multi_reduction <maximumf>, %71, %cst_21 [1] : vector<12x16xf32> to vector<12xf32>
    %73 = vector.shape_cast %72 : vector<12xf32> to vector<12x1xf32>
    %74 = vector.broadcast %73 : vector<12x1xf32> to vector<12x16xf32>
    %75 = arith.subf %71, %74 : vector<12x16xf32>
    %76 = math.exp %75 : vector<12x16xf32>
    %cst_22 = arith.constant dense<0.000000e+00> : vector<12xf32>
    %77 = vector.multi_reduction <add>, %76, %cst_22 [1] : vector<12x16xf32> to vector<12xf32>
    %78 = vector.shape_cast %77 : vector<12xf32> to vector<12x1xf32>
    %cst_23 = arith.constant 1.000000e-30 : f32
    %79 = vector.broadcast %cst_23 : f32 to vector<12x1xf32>
    %80 = arith.maximumf %78, %79 : vector<12x1xf32>
    %cst_24 = arith.constant 1.000000e+00 : f32
    %81 = vector.broadcast %cst_24 : f32 to vector<12x1xf32>
    %82 = arith.divf %81, %80 : vector<12x1xf32>
    %cst_25 = arith.constant dense<0.000000e+00> : vector<12x8xf32>
    %83 = tpu.matmul %76, %60, %cst_25 {dimension_numbers = #tpu.dot_dimension_numbers<[1], [0], [0], [1], [0, 0, 1, 1], [], []>} : vector<12x16xf32>, vector<16x8xf32>, vector<12x8xf32> -> vector<12x8xf32>
    %84 = vector.broadcast %82 : vector<12x1xf32> to vector<12x8xf32>
    %85 = arith.mulf %83, %84 : vector<12x8xf32>
    %86 = vector.extract_strided_slice %3 {offsets = [0, 24], sizes = [16, 8], strides = [1, 1]} : vector<16x32xf32> to vector<16x8xf32>
    %87 = vector.extract_strided_slice %6 {offsets = [0, 3], sizes = [12, 1], strides = [1, 1]} : vector<12x4xf32> to vector<12x1xf32>
    %88 = vector.extract_strided_slice %5 {offsets = [3, 0], sizes = [1, 16], strides = [1, 1]} : vector<4x16xf32> to vector<1x16xf32>
    %89 = vector.broadcast %87 : vector<12x1xf32> to vector<12x16xf32>
    %90 = vector.broadcast %88 : vector<1x16xf32> to vector<12x16xf32>
    %91 = arith.addf %89, %90 : vector<12x16xf32>
    %cst_26 = arith.constant 0.000000e+00 : f32
    %92 = vector.broadcast %cst_26 : f32 to vector<12x16xf32>
    %93 = arith.cmpf ogt, %91, %92 : vector<12x16xf32>
    %cst_27 = arith.constant 0.00999999977 : f32
    %94 = vector.broadcast %cst_27 : f32 to vector<12x16xf32>
    %95 = arith.mulf %94, %91 : vector<12x16xf32>
    %96 = arith.select %93, %91, %95 : vector<12x16xi1>, vector<12x16xf32>
    %97 = arith.addf %96, %7 : vector<12x16xf32>
    %cst_28 = arith.constant dense<0xFF800000> : vector<12xf32>
    %98 = vector.multi_reduction <maximumf>, %97, %cst_28 [1] : vector<12x16xf32> to vector<12xf32>
    %99 = vector.shape_cast %98 : vector<12xf32> to vector<12x1xf32>
    %100 = vector.broadcast %99 : vector<12x1xf32> to vector<12x16xf32>
    %101 = arith.subf %97, %100 : vector<12x16xf32>
    %102 = math.exp %101 : vector<12x16xf32>
    %cst_29 = arith.constant dense<0.000000e+00> : vector<12xf32>
    %103 = vector.multi_reduction <add>, %102, %cst_29 [1] : vector<12x16xf32> to vector<12xf32>
    %104 = vector.shape_cast %103 : vector<12xf32> to vector<12x1xf32>
    %cst_30 = arith.constant 1.000000e-30 : f32
    %105 = vector.broadcast %cst_30 : f32 to vector<12x1xf32>
    %106 = arith.maximumf %104, %105 : vector<12x1xf32>
    %cst_31 = arith.constant 1.000000e+00 : f32
    %107 = vector.broadcast %cst_31 : f32 to vector<12x1xf32>
    %108 = arith.divf %107, %106 : vector<12x1xf32>
    %cst_32 = arith.constant dense<0.000000e+00> : vector<12x8xf32>
    %109 = tpu.matmul %102, %86, %cst_32 {dimension_numbers = #tpu.dot_dimension_numbers<[1], [0], [0], [1], [0, 0, 1, 1], [], []>} : vector<12x16xf32>, vector<16x8xf32>, vector<12x8xf32> -> vector<12x8xf32>
    %110 = vector.broadcast %108 : vector<12x1xf32> to vector<12x8xf32>
    %111 = arith.mulf %109, %110 : vector<12x8xf32>
    %112 = tpu.concatenate %33, %59, %85, %111 in 1 : vector<12x8xf32>, vector<12x8xf32>, vector<12x8xf32>, vector<12x8xf32> -> vector<12x32xf32>
    %cst_33 = arith.constant 0.000000e+00 : f32
    %113 = vector.broadcast %cst_33 : f32 to vector<12x32xf32>
    %114 = arith.cmpf ogt, %112, %113 : vector<12x32xf32>
    %115 = math.exp %112 : vector<12x32xf32>
    %cst_34 = arith.constant 1.000000e+00 : f32
    %116 = vector.broadcast %cst_34 : f32 to vector<12x32xf32>
    %117 = arith.subf %115, %116 : vector<12x32xf32>
    %118 = arith.select %114, %112, %117 : vector<12x32xi1>, vector<12x32xf32>
    %c0_35 = arith.constant 0 : index
    %c0_36 = arith.constant 0 : index
    %119 = vector.load %arg3[%c0_35, %c0_36] : memref<32x18xf32, #tpu.memory_space<vmem>>, vector<32x18xf32>
    %cst_37 = arith.constant dense<0.000000e+00> : vector<12x18xf32>
    %120 = tpu.matmul %118, %119, %cst_37 {dimension_numbers = #tpu.dot_dimension_numbers<[1], [0], [0], [1], [0, 0, 1, 1], [], []>} : vector<12x32xf32>, vector<32x18xf32>, vector<12x18xf32> -> vector<12x18xf32>
    %121 = vector.extract_strided_slice %120 {offsets = [0, 0], sizes = [12, 16], strides = [1, 1]} : vector<12x18xf32> to vector<12x16xf32>
    %122 = vector.extract_strided_slice %120 {offsets = [0, 16], sizes = [12, 1], strides = [1, 1]} : vector<12x18xf32> to vector<12x1xf32>
    %123 = tpu.transpose %122, [1, 0] : vector<12x1xf32> -> vector<1x12xf32>
    %124 = vector.extract_strided_slice %120 {offsets = [0, 17], sizes = [8, 1], strides = [1, 1]} : vector<12x18xf32> to vector<8x1xf32>
    %c0_38 = arith.constant 0 : index
    %c0_39 = arith.constant 0 : index
    %125 = vector.load %arg4[%c0_38, %c0_39] : memref<8x12xf32, #tpu.memory_space<vmem>>, vector<8x12xf32>
    %126 = vector.broadcast %124 : vector<8x1xf32> to vector<8x12xf32>
    %127 = vector.broadcast %123 : vector<1x12xf32> to vector<8x12xf32>
    %128 = arith.addf %126, %127 : vector<8x12xf32>
    %cst_40 = arith.constant 0.000000e+00 : f32
    %129 = vector.broadcast %cst_40 : f32 to vector<8x12xf32>
    %130 = arith.cmpf ogt, %128, %129 : vector<8x12xf32>
    %cst_41 = arith.constant 0.00999999977 : f32
    %131 = vector.broadcast %cst_41 : f32 to vector<8x12xf32>
    %132 = arith.mulf %131, %128 : vector<8x12xf32>
    %133 = arith.select %130, %128, %132 : vector<8x12xi1>, vector<8x12xf32>
    %134 = arith.addf %133, %125 : vector<8x12xf32>
    %cst_42 = arith.constant dense<0xFF800000> : vector<8xf32>
    %135 = vector.multi_reduction <maximumf>, %134, %cst_42 [1] : vector<8x12xf32> to vector<8xf32>
    %136 = vector.shape_cast %135 : vector<8xf32> to vector<8x1xf32>
    %137 = vector.broadcast %136 : vector<8x1xf32> to vector<8x12xf32>
    %138 = arith.subf %134, %137 : vector<8x12xf32>
    %139 = math.exp %138 : vector<8x12xf32>
    %cst_43 = arith.constant dense<0.000000e+00> : vector<8xf32>
    %140 = vector.multi_reduction <add>, %139, %cst_43 [1] : vector<8x12xf32> to vector<8xf32>
    %141 = vector.shape_cast %140 : vector<8xf32> to vector<8x1xf32>
    %cst_44 = arith.constant 1.000000e-30 : f32
    %142 = vector.broadcast %cst_44 : f32 to vector<8x1xf32>
    %143 = arith.maximumf %141, %142 : vector<8x1xf32>
    %cst_45 = arith.constant 1.000000e+00 : f32
    %144 = vector.broadcast %cst_45 : f32 to vector<8x1xf32>
    %145 = arith.divf %144, %143 : vector<8x1xf32>
    %cst_46 = arith.constant dense<0.000000e+00> : vector<8x16xf32>
    %146 = tpu.matmul %139, %121, %cst_46 {dimension_numbers = #tpu.dot_dimension_numbers<[1], [0], [0], [1], [0, 0, 1, 1], [], []>} : vector<8x12xf32>, vector<12x16xf32>, vector<8x16xf32> -> vector<8x16xf32>
    %147 = vector.broadcast %145 : vector<8x1xf32> to vector<8x16xf32>
    %148 = arith.mulf %146, %147 : vector<8x16xf32>
    %c0_47 = arith.constant 0 : index
    %c0_48 = arith.constant 0 : index
    %149 = vector.load %arg5[%c0_47, %c0_48] : memref<8x16xf32, #tpu.memory_space<vmem>>, vector<8x16xf32>
    tpu.vector_store %arg5[%c0_47, %c0_48], %148 {strides = array<i32>} : memref<8x16xf32, #tpu.memory_space<vmem>>, vector<8x16xf32>,
    return
  }
}

</mosaic_0001>

<bundles_post_ra>
// kernel: tpu_custom_call.1
= control target key start
LH: loop header
LB: loop body
LE: loop exit
PB: predicated region body
PF: predicated region fallthrough
CT: control target
= control target key end

     0   :  { %10 = vsyncpa [#allocation3], 0  ;;  %s1074_s0 = inlined_call_operand.vmem [shape: f32[16,32], index: 0, kind: input, shape index: {}]   ;;  %s1075_s1 = inlined_call_operand.vmem [shape: f32[32,40], index: 1, kind: input, shape index: {}]   ;;  %s1076_s2 = inlined_call_operand.hbm [shape: f32[12,16], index: 2, kind: input, shape index: {}]   ;;  %s1077_s3 = inlined_call_operand.vmem [shape: f32[32,18], index: 3, kind: input, shape index: {}]   ;;  %s1078_s4 = inlined_call_operand.vmem [shape: f32[8,12], index: 4, kind: input, shape index: {}]   ;;  %s1079_s5 = inlined_call_operand.hbm [shape: f32[8,16], index: 5, kind: output, shape index: {}]  }
   0x1   :  { %11 = vsyncpa [#allocation4], 0  ;;  %s20_s20 = sshll.u32 %s1076_s2, 4  ;;  %s883_s21 = smov [#allocation2]   ;;  %s21_s20 = int_to_ptr.hbm [resolvable:$true] %s20_s20 }
   0x2   :  { %s22_s22 = sshll.u32 %s883_s21, 4  ;;  %s884_s23 = smov 128   ;;  %s23_s22 = int_to_ptr.vmem [resolvable:$true] %s22_s22 }
   0x3   :  { %s885_s24 = smov 8  }
   0x4   :  { %28 = dma.hbm_to_vmem [thread:$0]  %s21_s20, 256, %s23_s22, [#allocation3], %s884_s23, %s884_s23, %s885_s24  }
   0x5   :  { %879 = dma.done.wait [#allocation3], 256  }
   0x6   :  { %880 = vsyncadd [#allocation3], 4294967040  ;;  %v886_v0 = vmov 38   ;;  %v887_v1 = vmov 37   ;;  %v42_v2 = vld [vmem:[%s1075_s1 + $0x18] sm:$0xff]  ;;  %v41_v3 = vld [vmem:[%s1075_s1 + $0x10] sm:$0xff] }
   0x7   :  { %767 = vset.pattern.permute.xlu2 %v886_v0  ;;  %766 = vset.pattern.permute.xlu1 %v887_v1  ;;  %v40_v4 = vld [vmem:[%s1075_s1 + $0x8] sm:$0xff]  ;;  %v39_v5 = vld [vmem:[%s1075_s1] sm:$0xff]  ;;  %vm43_vm0 = vcmask 261120   ;;  %v888_v8 = vmov 39   ;;  %s889_s1 = smov 96   ;;  %v890_v11 = vmov 36  }
   0x8   :  { %62 = vmatpush.msra.mxu0 %v42_v2  ;;  %v37_v6 = vld [vmem:[%s1074_s0] sm:$0xff]  ;;  %v38_v7 = vld [vmem:[%s1074_s0 + $0x8] sm:$0xff]  ;;  %768 = vset.pattern.permute.xlu0 %v888_v8  ;;  %s891_s0 = smov 120   ;;  %vm138_vm1 = vcmask 125952   ;;  %vm134_vm2 = vcmask 130048   ;;  %s892_s11 = smov 112  }
   0x9   :  { %v114_v35 = vld [vmem:[#allocation2 + $0x8] sm:$0xf]  ;;  %v113_v36 = vld [vmem:[#allocation2] sm:$0xff]  ;;  %s893_s12 = smov 104   ;;  %s894_s13 = smov 16  }
   0xa   :  { %63 = vmatpush.msra.mxu0 %v41_v3  ;;  %s895_s14 = smov 24   ;;  %s722_s27 = sshll.u32 %s1079_s5, 4  ;;  %s723_s27 = int_to_ptr.hbm [resolvable:$true] %s722_s27 }
   0xc   :  { %64 = vmatpush.msra.mxu0 %v40_v4 }
   0xe   :  { %65 = vmatpush.msra.mxu0 %v39_v5 }
   0xf   :  { %732 = vmatmul.msk.f32.vlgmr.msra.gmra.mxu0 %vm43_vm0, %v37_v6 }
  0x17   :  { %733 = vmatmul.msk.f32.gmra.mxu0 %vm43_vm0, %v38_v7 }
  0x8c   :  { %v67_v9 = vpop.f32.mrf.mxu0 }
  0x8d   :  { %324 = vperm.xlu2 %767, %v67_v9   ;;  %218 = vperm.xlu1 %766, %v67_v9  }
  0x8e   :  { %75 = vrot.lane.b32.xlu0 %v67_v9, %s889_s1 }
  0x94   :  { %v70_v10 = vpop.f32.mrf.mxu0 }
  0x95   :  { %769 = vset.pattern.permute.xlu2 %v890_v11  ;;  %770 = vset.pattern.permute.xlu1 %v890_v11  ;;  %v952_v12 = vpack.i.bf16 %v67_v9, %v70_v10 }
  0x96   :  { %77 = vrot.lane.b32.xlu0 %v70_v10, %s889_s1  ;;  %206 = vmatpush.msrb.mxu0 %v70_v10 }
  0x97   :  { %748 = vmatpush.msra.mxu1 %v70_v10  ;;  %116 = vperm.xlu2 %769, %v67_v9  }
  0x98   :  { %120 = vperm.xlu1 %770, %v70_v10   ;;  %207 = vmatpush.msrb.mxu0 %v67_v9 }
  0x99   :  { %749 = vmatpush.msra.mxu1 %v67_v9 }
  0x9e   :  { %430 = vperm.xlu0 %768, %v67_v9  }
  0x9f   :  { %771 = vset.pattern.permute.xlu2 %v887_v1 }
  0xa0   :  { %772 = vset.pattern.permute.xlu1 %v886_v0  ;;  %222 = vperm.xlu2 %771, %v70_v10  }
  0xa1   :  { %328 = vperm.xlu1 %772, %v70_v10  }
  0xa6   :  { %775 = vrot.lane.b32.xlu0 %v952_v12, %s891_s0 }
  0xa8   :  { %773 = vset.pattern.permute.xlu2 %v888_v8 }
  0xa9   :  { %434 = vperm.xlu2 %773, %v70_v10  }
  0xe7   :  { %v325_v20 = vpop.permute.xlu2 %324 }
  0xf1   :  { %v117_v22 = vpop.permute.xlu2 %116 }
  0xfa   :  { %v223_v24 = vpop.permute.xlu2 %222 }
  0xff   :  { %v219_v19 = vpop.permute.xlu1 %218 }
 0x100   :  { %v76_v13 = vpop.permute.xlu0 %75 }
 0x101   :  { %81 = vxpose.xlu1.b32.start [1/2] (short) (narrow) %v76_v13, 8 }
 0x103   :  { %v435_v49 = vpop.permute.xlu2 %434 }
 0x108   :  { %v78_v14 = vpop.permute.xlu0 %77 }
 0x109   :  { %82 = vxpose.xlu1.b32.end [2/2] (short) (narrow) %v78_v14, 8 }
 0x10a   :  { %v121_v21 = vpop.permute.xlu1 %120 }
 0x110   :  { %v431_v15 = vpop.permute.xlu0 %430 }
 0x113   :  { %v329_v23 = vpop.permute.xlu1 %328 }
 0x118   :  { %v776_v16 = vpop.permute.xlu0 %775 }
 0x119   :  { %v777_v17 = vunpack.i.l.bf16 %v776_v16  ;;  %v778_v18 = vunpack.i.h.bf16 %v776_v16 }
 0x11b   :  { %312 = vmatpush.msra.mxu2 %v777_v17 }
 0x11d   :  { %313 = vmatpush.msra.mxu2 %v778_v18 }
 0x1a5   :  { %v97_v25 = vpop.trf.xlu1 }
 0x1a6   :  { %v123_v26 = vperm.slane %v97_v25, 0  ;;  %v225_v27 = vperm.slane %v97_v25, 1  ;;  %v331_v28 = vperm.slane %v97_v25, 2  ;;  %v437_v34 = vperm.slane %v97_v25, 3 }
 0x1a8   :  { %v125_v29 = vadd.f32 %v123_v26, %v121_v21  ;;  %v226_v30 = vadd.f32 %v225_v27, %v219_v19  ;;  %v227_v31 = vadd.f32 %v225_v27, %v223_v24  ;;  %v332_v32 = vadd.f32 %v331_v28, %v325_v20 }
 0x1a9   :  { %v333_v33 = vadd.f32 %v331_v28, %v329_v23  ;;  %v124_v39 = vadd.f32 %v123_v26, %v117_v22  ;;  %v438_v50 = vadd.f32 %v437_v34, %v431_v15  ;;  %v439_v53 = vadd.f32 %v437_v34, %v435_v49 }
 0x1aa   :  { %vm228_vm3 = vcmp.gt.f32.partialorder %v226_v30, 0.0  ;;  %v230_v37 = vmul.f32 0.01, %v226_v30  ;;  %vm127_vm4 = vcmp.gt.f32.partialorder %v125_v29, 0.0  ;;  %v129_v38 = vmul.f32 0.01, %v125_v29 }
 0x1ab   :  { %vm335_vm5 = vcmp.gt.f32.partialorder %v333_v33, 0.0  ;;  %v337_v40 = vmul.f32 0.01, %v333_v33  ;;  %vm334_vm6 = vcmp.gt.f32.partialorder %v332_v32, 0.0  ;;  %v336_v43 = vmul.f32 0.01, %v332_v32 }
 0x1ac   :  { %v232_v41 = vsel %vm228_vm3, %v226_v30, %v230_v37  ;;  %v131_v42 = vsel %vm127_vm4, %v125_v29, %v129_v38  ;;  %v231_v44 = vmul.f32 0.01, %v227_v31  ;;  %vm229_vm7 = vcmp.gt.f32.partialorder %v227_v31, 0.0 }
 0x1ad   :  { %v339_v45 = vsel %vm335_vm5, %v333_v33, %v337_v40  ;;  %v234_v46 = vadd.f32 %v232_v41, %v113_v36  ;;  %v133_v47 = vadd.f32 %v131_v42, %v114_v35  ;;  %v338_v55 = vsel %vm334_vm6, %v332_v32, %v336_v43 }
 0x1ae   :  { %v955_v48 = vadd.f32 %v339_v45, %v114_v35  ;;  %v233_v56 = vsel %vm229_vm7, %v227_v31, %v231_v44  ;;  %vm126_vm8 = vcmp.gt.f32.partialorder %v124_v39, 0.0  ;;  %v128_v57 = vmul.f32 0.01, %v124_v39 }
 0x1af   :  { %v236_v51 = vsel %vm134_vm2, %v234_v46, -inf  ;;  %v139_v52 = vsel %vm138_vm1, %v133_v47, -inf  ;;  %v340_v58 = vadd.f32 %v338_v55, %v113_v36  ;;  %v235_v59 = vadd.f32 %v233_v56, %v114_v35 }
 0x1b0   :  { %v345_v54 = vsel %vm138_vm1, %v955_v48, -inf  ;;  %237 = vmax.xlane.f32.xlu2 %v236_v51  ;;  %140 = vmax.xlane.f32.xlu0 %v139_v52  ;;  %v130_v60 = vsel %vm126_vm8, %v124_v39, %v128_v57  ;;  %v443_v61 = vmul.f32 0.01, %v439_v53  ;;  %v442_v62 = vmul.f32 0.01, %v438_v50 }
 0x1b1   :  { %346 = vmax.xlane.f32.xlu1 %v345_v54  ;;  %v962_v63 = vadd.f32 %v130_v60, %v113_v36  ;;  %vm441_vm9 = vcmp.gt.f32.partialorder %v439_v53, 0.0  ;;  %vm440_vm10 = vcmp.gt.f32.partialorder %v438_v50, 0.0  ;;  %v342_v0 = vsel %vm134_vm2, %v340_v58, -inf }
 0x1b2   :  { %v239_v1 = vsel %vm138_vm1, %v235_v59, -inf  ;;  %v445_v2 = vsel %vm441_vm9, %v439_v53, %v443_v61  ;;  %v444_v3 = vsel %vm440_vm10, %v438_v50, %v442_v62 }
 0x1b3   :  { %v447_v4 = vadd.f32 %v445_v2, %v114_v35  ;;  %v446_v5 = vadd.f32 %v444_v3, %v113_v36  ;;  %v135_v8 = vsel %vm134_vm2, %v962_v63, -inf }
 0x1b5   :  { %v451_v6 = vsel %vm138_vm1, %v447_v4, -inf  ;;  %v448_v7 = vsel %vm134_vm2, %v446_v5, -inf }
 0x1b8   :  { %343 = vmax.xlane.f32.xlu2 %v342_v0  ;;  %240 = vmax.xlane.f32.xlu0 %v239_v1 }
 0x1c0   :  { %452 = vmax.xlane.f32.xlu0 %v451_v6  ;;  %449 = vmax.xlane.f32.xlu2 %v448_v7 }
 0x1d8   :  { %780 = vrot.lane.b32.xlu2 %v952_v12, %s892_s11 }
 0x1e0   :  { %785 = vrot.lane.b32.xlu2 %v952_v12, %s893_s12 }
 0x209   :  { %136 = vmax.xlane.f32.xlu2 %v135_v8 }
 0x223   :  { %v238_v9 = vpop.xlane.xlu2 %237  ;;  %v141_v10 = vpop.xlane.xlu0 %140 }
 0x224   :  { %v242_v11 = vsub.f32 %v234_v46, %v238_v9  ;;  %v143_v13 = vsub.f32 %v133_v47, %v141_v10  ;;  %v347_v24 = vpop.xlane.xlu1 %346 }
 0x225   :  { %v349_v30 = vsub.f32 %v955_v48, %v347_v24 }
 0x226   :  { %v244_v14 = vmul.f32 1.442695, %v242_v11  ;;  %v146_v15 = vmul.f32 1.442695, %v143_v13 }
 0x227   :  { %v352_v36 = vmul.f32 1.442695, %v349_v30 }
 0x228   :  { %791 = vpow2.f32 %v244_v14 }
 0x229   :  { %793 = vpow2.f32 %v146_v15 }
 0x22b   :  { %v344_v16 = vpop.xlane.xlu2 %343  ;;  %v241_v17 = vpop.xlane.xlu0 %240 }
 0x22c   :  { %v348_v18 = vsub.f32 %v340_v58, %v344_v16  ;;  %v243_v19 = vsub.f32 %v235_v59, %v241_v17 }
 0x22e   :  { %v792_v20 = vpop.eup %791  ;;  %v350_v21 = vmul.f32 1.442695, %v348_v18  ;;  %v246_v22 = vmul.f32 1.442695, %v243_v19 }
 0x22f   :  { %736 = vmatmul.msk.f32.vlgmr.msra.gmra.mxu2 %vm134_vm2, %v792_v20  ;;  %v248_v12 = vsel %vm134_vm2, %v792_v20, 0.0  ;;  %v794_v23 = vpop.eup %793 }
 0x230   :  { %795 = vpow2.f32 %v350_v21  ;;  %249 = vadd.xlane.f32.xlu0 %v248_v12  ;;  %735 = vmatmul.msk.f32.vlgmr.msra.gmra.mxu1 %vm134_vm2, %v794_v23  ;;  %v151_v49 = vsel %vm138_vm1, %v794_v23, 0.0 }
 0x231   :  { %797 = vpow2.f32 %v246_v22 }
 0x233   :  { %v450_v25 = vpop.xlane.xlu2 %449  ;;  %v453_v26 = vpop.xlane.xlu0 %452 }
 0x234   :  { %v454_v27 = vsub.f32 %v446_v5, %v450_v25  ;;  %v455_v28 = vsub.f32 %v447_v4, %v453_v26 }
 0x236   :  { %v796_v29 = vpop.eup %795  ;;  %v456_v31 = vmul.f32 1.442695, %v454_v27  ;;  %v458_v32 = vmul.f32 1.442695, %v455_v28 }
 0x237   :  { %v798_v33 = vpop.eup %797  ;;  %v354_v34 = vsel %vm134_vm2, %v796_v29, 0.0 }
 0x238   :  { %799 = vpow2.f32 %v456_v31  ;;  %737 = vmatmul.msk.f32.gmra.mxu2 %vm134_vm2, %v798_v33  ;;  %355 = vadd.xlane.f32.xlu0 %v354_v34  ;;  %v251_v35 = vsel %vm138_vm1, %v798_v33, 0.0 }
 0x239   :  { %801 = vpow2.f32 %v458_v32  ;;  %252 = vadd.xlane.f32.xlu2 %v251_v35 }
 0x23a   :  { %803 = vpow2.f32 %v352_v36 }
 0x23b   :  { %v781_v37 = vpop.permute.xlu2 %780 }
 0x23c   :  { %v782_v38 = vunpack.i.l.bf16 %v781_v37  ;;  %v783_v40 = vunpack.i.h.bf16 %v781_v37 }
 0x23e   :  { %v800_v39 = vpop.eup %799  ;;  %418 = vmatpush.msra.mxu3 %v782_v38 }
 0x23f   :  { %v802_v41 = vpop.eup %801  ;;  %v460_v42 = vsel %vm134_vm2, %v800_v39, 0.0 }
 0x240   :  { %461 = vadd.xlane.f32.xlu0 %v460_v42  ;;  %419 = vmatpush.msra.mxu3 %v783_v40  ;;  %v463_v43 = vsel %vm138_vm1, %v802_v41, 0.0  ;;  %v804_v45 = vpop.eup %803 }
 0x241   :  { %464 = vadd.xlane.f32.xlu2 %v463_v43  ;;  %738 = vmatmul.msk.f32.vlgmr.msra.gmra.mxu3 %vm134_vm2, %v796_v29  ;;  %v357_v48 = vsel %vm138_vm1, %v804_v45, 0.0 }
 0x243   :  { %v786_v44 = vpop.permute.xlu2 %785 }
 0x244   :  { %v787_v46 = vunpack.i.l.bf16 %v786_v44  ;;  %v788_v47 = vunpack.i.h.bf16 %v786_v44 }
 0x246   :  { %524 = vmatpush.msrb.mxu1 %v787_v46 }
 0x248   :  { %358 = vadd.xlane.f32.xlu0 %v357_v48  ;;  %525 = vmatpush.msrb.mxu1 %v788_v47 }
 0x249   :  { %152 = vadd.xlane.f32.xlu2 %v151_v49  ;;  %739 = vmatmul.msk.f32.gmra.mxu3 %vm134_vm2, %v804_v45 }
 0x24a   :  { %740 = vmatmul.msk.f32.vlgmr.msrb.gmra.mxu1 %vm134_vm2, %v800_v39 }
 0x252   :  { %741 = vmatmul.msk.f32.gmra.mxu1 %vm134_vm2, %v802_v41 }
 0x27c   :  { %v137_v50 = vpop.xlane.xlu2 %136 }
 0x27d   :  { %v142_v51 = vsub.f32 %v962_v63, %v137_v50 }
 0x27f   :  { %v144_v52 = vmul.f32 1.442695, %v142_v51 }
 0x281   :  { %805 = vpow2.f32 %v144_v52 }
 0x287   :  { %v806_v53 = vpop.eup %805 }
 0x288   :  { %734 = vmatmul.msk.f32.vlgmr.msrb.gmra.mxu0 %vm134_vm2, %v806_v53  ;;  %v148_v54 = vsel %vm134_vm2, %v806_v53, 0.0 }
 0x289   :  { %149 = vadd.xlane.f32.xlu0 %v148_v54 }
 0x2a3   :  { %v250_v55 = vpop.xlane.xlu0 %249 }
 0x2a4   :  { %v254_v56 = vmax.f32 %v250_v55, 1e-30 }
 0x2a6   :  { %807 = vrcp.f32 %v254_v56  ;;  %v267_v0 = vand.u32 2147483648, %v254_v56  ;;  %v265_v2 = vand.u32 2147483647, %v254_v56  ;;  %vm261_vm12 = vweird.f32 %v254_v56 }
 0x2a8   :  { %v268_v6 = vor.u32 1.1754944e-38, %v267_v0  ;;  %vm266_vm14 = vcmp.eq.f32.partialorder %v265_v2, 8.507059e+37 }
 0x2ab   :  { %v356_v57 = vpop.xlane.xlu0 %355 }
 0x2ac   :  { %v808_v58 = vpop.eup %807  ;;  %v253_v59 = vpop.xlane.xlu2 %252  ;;  %v360_v60 = vmax.f32 %v356_v57, 1e-30 }
 0x2ad   :  { %v991_v61 = vmax.f32 %v253_v59, 1e-30  ;;  %v257_v62 = vmul.f32 %v808_v58, %v254_v56  ;;  %vm262_vm11 = vweird.f32 %v808_v58  ;;  %v1007_v28 = vpop.f32.mrf.mxu1 }
 0x2ae   :  { %809 = vrcp.f32 %v360_v60  ;;  %vm263_vm13 = vmor %vm261_vm12, %vm262_vm11  ;;  %v371_v26 = vand.u32 2147483647, %v360_v60  ;;  %v373_v27 = vand.u32 2147483648, %v360_v60  ;;  %vm367_vm1 = vweird.f32 %v360_v60 }
 0x2af   :  { %811 = vrcp.f32 %v991_v61  ;;  %v258_v63 = vsub.f32 1.0, %v257_v62  ;;  %v280_v31 = vand.u32 2147483647, %v991_v61  ;;  %v282_v38 = vand.u32 2147483648, %v991_v61 }
 0x2b0   :  { %vm372_vm5 = vcmp.eq.f32.partialorder %v371_v26, 8.507059e+37  ;;  %v374_v39 = vor.u32 1.1754944e-38, %v373_v27  ;;  %vm276_vm8 = vweird.f32 %v991_v61 }
 0x2b1   :  { %v259_v1 = vmul.f32 %v808_v58, %v258_v63  ;;  %vm281_vm12 = vcmp.eq.f32.partialorder %v280_v31, 8.507059e+37  ;;  %v283_v54 = vor.u32 1.1754944e-38, %v282_v38 }
 0x2b2   :  { %v315_v15 = vpop.f32.mrf.mxu2 }
 0x2b3   :  { %v260_v3 = vadd.f32 %v808_v58, %v259_v1  ;;  %v462_v4 = vpop.xlane.xlu0 %461 }
 0x2b4   :  { %v810_v5 = vpop.eup %809  ;;  %v465_v7 = vpop.xlane.xlu2 %464  ;;  %v466_v8 = vmax.f32 %v462_v4, 1e-30 }
 0x2b5   :  { %v994_v9 = vpop.eup %811  ;;  %v264_v10 = vsel %vm263_vm13, %v808_v58, %v260_v3  ;;  %v996_v11 = vmax.f32 %v465_v7, 1e-30  ;;  %v363_v13 = vmul.f32 %v810_v5, %v360_v60  ;;  %vm368_vm15 = vweird.f32 %v810_v5 }
 0x2b6   :  { %v269_v14 = vsel %vm266_vm14, %v268_v6, %v264_v10  ;;  %813 = vrcp.f32 %v466_v8  ;;  %v272_v17 = vmul.f32 %v994_v9, %v991_v61  ;;  %vm1011_vm3 = vmor %vm367_vm1, %vm368_vm15  ;;  %v479_v33 = vand.u32 2147483648, %v466_v8 }
 0x2b7   :  { %v321_v16 = vmul.f32 %v315_v15, %v269_v14  ;;  %815 = vrcp.f32 %v996_v11  ;;  %v364_v18 = vsub.f32 1.0, %v363_v13  ;;  %v477_v37 = vand.u32 2147483647, %v466_v8 }
 0x2b8   :  { %v273_v20 = vsub.f32 1.0, %v272_v17  ;;  %vm277_vm6 = vweird.f32 %v994_v9  ;;  %vm473_vm7 = vweird.f32 %v466_v8  ;;  %v480_v46 = vor.u32 1.1754944e-38, %v479_v33 }
 0x2b9   :  { %537 = vrot.lane.b32.xlu1 %v321_v16, %s885_s24  ;;  %v365_v19 = vmul.f32 %v810_v5, %v364_v18  ;;  %vm478_vm10 = vcmp.eq.f32.partialorder %v477_v37, 8.507059e+37  ;;  %vm1025_vm11 = vmor %vm276_vm8, %vm277_vm6  ;;  %v494_v62 = vand.u32 2147483648, %v996_v11  ;;  %vm488_vm15 = vweird.f32 %v996_v11 }
 0x2ba   :  { %v274_v29 = vmul.f32 %v994_v9, %v273_v20  ;;  %v492_v0 = vand.u32 2147483647, %v996_v11  ;;  %v580_v20 = vld [vmem:[%s1077_s3 + $0x18] sm:$0xff] }
 0x2bb   :  { %v359_v21 = vpop.xlane.xlu0 %358  ;;  %v366_v24 = vadd.f32 %v810_v5, %v365_v19  ;;  %v318_v2 = vpop.f32.mrf.mxu2  ;;  %v495_v7 = vor.u32 1.1754944e-38, %v494_v62  ;;  %599 = vmatpush.msrb.mxu2 %v580_v20 }
 0x2bc   :  { %v814_v22 = vpop.eup %813  ;;  %v1002_v12 = vmax.f32 %v359_v21, 1e-30  ;;  %v275_v41 = vadd.f32 %v994_v9, %v274_v29  ;;  %vm493_vm6 = vcmp.eq.f32.partialorder %v492_v0, 8.507059e+37  ;;  %v153_v17 = vpop.xlane.xlu2 %152  ;;  %v579_v21 = vld [vmem:[%s1077_s3 + $0x10] sm:$0xff] }
 0x2bd   :  { %v1004_v23 = vpop.eup %815  ;;  %v469_v25 = vmul.f32 %v814_v22, %v466_v8  ;;  %v370_v35 = vsel %vm1011_vm3, %v810_v5, %v366_v24  ;;  %vm474_vm4 = vweird.f32 %v814_v22  ;;  %v155_v18 = vmax.f32 %v153_v17, 1e-30  ;;  %600 = vmatpush.msrb.mxu2 %v579_v21 }
 0x2be   :  { %817 = vrcp.f32 %v1002_v12  ;;  %v484_v34 = vmul.f32 %v1004_v23, %v996_v11  ;;  %v375_v44 = vsel %vm372_vm5, %v374_v39, %v370_v35  ;;  %vm475_vm9 = vmor %vm473_vm7, %vm474_vm4  ;;  %v279_v53 = vsel %vm1025_vm11, %v994_v9, %v275_v41 }
 0x2bf   :  { %v470_v30 = vsub.f32 1.0, %v469_v25  ;;  %v388_v58 = vand.u32 2147483648, %v1002_v12  ;;  %vm489_vm13 = vweird.f32 %v1004_v23  ;;  %v386_v61 = vand.u32 2147483647, %v1002_v12 }
 0x2c0   :  { %v485_v40 = vsub.f32 1.0, %v484_v34  ;;  %v284_v63 = vsel %vm281_vm12, %v283_v54, %v279_v53  ;;  %vm382_vm1 = vweird.f32 %v1002_v12  ;;  %vm490_vm3 = vmor %vm488_vm15, %vm489_vm13  ;;  %vm559_vm11 = vcmask 64512  }
 0x2c1   :  { %v471_v36 = vmul.f32 %v814_v22, %v470_v30  ;;  %v389_v3 = vor.u32 1.1754944e-38, %v388_v58  ;;  %v322_v5 = vmul.f32 %v318_v2, %v284_v63  ;;  %vm387_vm5 = vcmp.eq.f32.partialorder %v386_v61, 8.507059e+37 }
 0x2c2   :  { %v486_v47 = vmul.f32 %v1004_v23, %v485_v40  ;;  %vm564_vm13 = vcmask 195584  }
 0x2c3   :  { %v472_v42 = vadd.f32 %v814_v22, %v471_v36  ;;  %v896_v36 = vmov 17  }
 0x2c4   :  { %v818_v43 = vpop.eup %817  ;;  %v421_v45 = vpop.f32.mrf.mxu3  ;;  %v487_v59 = vadd.f32 %v1004_v23, %v486_v47  ;;  %789 = vset.pattern.permute.xlu2 %v896_v36 }
 0x2c5   :  { %v427_v48 = vmul.f32 %v421_v45, %v375_v44  ;;  %v476_v49 = vsel %vm475_vm9, %v814_v22, %v472_v42  ;;  %v378_v50 = vmul.f32 %v818_v43, %v1002_v12  ;;  %vm383_vm14 = vweird.f32 %v818_v43  ;;  %v578_v12 = vld [vmem:[%s1077_s3 + $0x8] sm:$0xff] }
 0x2c6   :  { %v481_v52 = vsel %vm478_vm10, %v480_v46, %v476_v49  ;;  %vm384_vm4 = vmor %vm382_vm1, %vm383_vm14  ;;  %v491_v4 = vsel %vm490_vm3, %v1004_v23, %v487_v59  ;;  %601 = vmatpush.msrb.mxu2 %v578_v12  ;;  %v577_v23 = vld [vmem:[%s1077_s3] sm:$0xff]  ;;  %v182_v42 = vand.u32 2147483648, %v155_v18  ;;  %vm176_vm14 = vweird.f32 %v155_v18 }
 0x2c7   :  { %v527_v55 = vpop.f32.mrf.mxu1  ;;  %545 = vrot.lane.b32.xlu0 %v427_v48, %s894_s13  ;;  %v379_v56 = vsub.f32 1.0, %v378_v50  ;;  %v496_v13 = vsel %vm493_vm6, %v495_v7, %v491_v4  ;;  %vm661_vm6 = vcmask 97280  }
 0x2c8   :  { %v533_v57 = vmul.f32 %v527_v55, %v481_v52  ;;  %602 = vmatpush.msrb.mxu2 %v577_v23  ;;  %v183_v50 = vor.u32 1.1754944e-38, %v182_v42 }
 0x2c9   :  { %v380_v60 = vmul.f32 %v818_v43, %v379_v56 }
 0x2ca   :  { %553 = vrot.lane.b32.xlu2 %v533_v57, %s895_s14 }
 0x2cb   :  { %v381_v1 = vadd.f32 %v818_v43, %v380_v60 }
 0x2cc   :  { %v424_v9 = vpop.f32.mrf.mxu3 }
 0x2cd   :  { %v385_v6 = vsel %vm384_vm4, %v818_v43, %v381_v1  ;;  %v180_v43 = vand.u32 2147483647, %v155_v18 }
 0x2ce   :  { %v390_v8 = vsel %vm387_vm5, %v389_v3, %v385_v6  ;;  %vm690_vm5 = vcmask 1043456  }
 0x2cf   :  { %v428_v10 = vmul.f32 %v424_v9, %v390_v8  ;;  %v530_v14 = vpop.f32.mrf.mxu1  ;;  %539 = vrot.lane.b32.xlu0 %v322_v5, %s885_s24  ;;  %vm181_vm1 = vcmp.eq.f32.partialorder %v180_v43, 8.507059e+37 }
 0x2d0   :  { %v534_v11 = vmul.f32 %v530_v14, %v496_v13  ;;  %v650_v13 = vld [vmem:[%s1078_s4] sm:$0xff]  ;;  %s897_s4 = smov [#allocation5]  }
 0x2d1   :  { %547 = vrot.lane.b32.xlu1 %v428_v10, %s894_s13  ;;  %s720_s24 = sshll.u32 %s897_s4, 4  ;;  %s721_s24 = int_to_ptr.vmem [resolvable:$true] %s720_s24 }
 0x2d2   :  { %555 = vrot.lane.b32.xlu2 %v534_v11, %s895_s14 }
 0x2fc   :  { %v150_v15 = vpop.xlane.xlu0 %149 }
 0x2fd   :  { %v154_v16 = vmax.f32 %v150_v15, 1e-30 }
 0x2ff   :  { %819 = vrcp.f32 %v154_v16  ;;  %v167_v31 = vand.u32 2147483648, %v154_v16  ;;  %vm161_vm8 = vweird.f32 %v154_v16  ;;  %v165_v32 = vand.u32 2147483647, %v154_v16 }
 0x300   :  { %821 = vrcp.f32 %v155_v18 }
 0x301   :  { %v168_v35 = vor.u32 1.1754944e-38, %v167_v31  ;;  %vm166_vm10 = vcmp.eq.f32.partialorder %v165_v32, 8.507059e+37 }
 0x305   :  { %v820_v19 = vpop.eup %819  ;;  %v209_v38 = vpop.f32.mrf.mxu0 }
 0x306   :  { %v157_v22 = vmul.f32 %v820_v19, %v154_v16  ;;  %v822_v25 = vpop.eup %821  ;;  %vm162_vm7 = vweird.f32 %v820_v19 }
 0x307   :  { %v172_v27 = vmul.f32 %v822_v25, %v155_v18  ;;  %vm163_vm9 = vmor %vm161_vm8, %vm162_vm7  ;;  %vm177_vm12 = vweird.f32 %v822_v25 }
 0x308   :  { %v158_v24 = vsub.f32 1.0, %v157_v22  ;;  %vm178_vm15 = vmor %vm176_vm14, %vm177_vm12 }
 0x309   :  { %v173_v30 = vsub.f32 1.0, %v172_v27 }
 0x30a   :  { %v159_v26 = vmul.f32 %v820_v19, %v158_v24 }
 0x30b   :  { %v174_v34 = vmul.f32 %v822_v25, %v173_v30 }
 0x30c   :  { %v160_v29 = vadd.f32 %v820_v19, %v159_v26 }
 0x30d   :  { %v175_v40 = vadd.f32 %v822_v25, %v174_v34 }
 0x30e   :  { %v164_v33 = vsel %vm163_vm9, %v820_v19, %v160_v29 }
 0x30f   :  { %v169_v37 = vsel %vm166_vm10, %v168_v35, %v164_v33  ;;  %v179_v48 = vsel %vm178_vm15, %v822_v25, %v175_v40 }
 0x310   :  { %v215_v41 = vmul.f32 %v209_v38, %v169_v37  ;;  %v184_v52 = vsel %vm181_vm1, %v183_v50, %v179_v48 }
 0x311   :  { %v216_v53 = vmul.f32 %v1007_v28, %v184_v52 }
 0x324   :  { %v554_v46 = vpop.permute.xlu2 %553 }
 0x32b   :  { %v538_v39 = vpop.permute.xlu1 %537 }
 0x32c   :  { %v560_v44 = vsel %vm559_vm11, %v215_v41, %v538_v39  ;;  %v556_v58 = vpop.permute.xlu2 %555 }
 0x339   :  { %v546_v45 = vpop.permute.xlu0 %545 }
 0x33a   :  { %v562_v47 = vsel %vm134_vm2, %v560_v44, %v546_v45 }
 0x33b   :  { %v565_v49 = vsel %vm564_vm13, %v562_v47, %v554_v46 }
 0x33c   :  { %v569_v51 = vmul.f32 1.442695, %v565_v49  ;;  %vm567_vm3 = vcmp.gt.f32.partialorder %v565_v49, 0.0 }
 0x33e   :  { %823 = vpow2.f32 %v569_v51 }
 0x341   :  { %v540_v54 = vpop.permute.xlu0 %539 }
 0x342   :  { %v561_v55 = vsel %vm559_vm11, %v216_v53, %v540_v54 }
 0x343   :  { %v548_v56 = vpop.permute.xlu1 %547 }
 0x344   :  { %v824_v57 = vpop.eup %823  ;;  %v563_v59 = vsel %vm134_vm2, %v561_v55, %v548_v56 }
 0x345   :  { %v742_v60 = vadd.f32 -1.0, %v824_v57  ;;  %v566_v61 = vsel %vm564_vm13, %v563_v59, %v556_v58 }
 0x346   :  { %v571_v62 = vmul.f32 1.442695, %v566_v61  ;;  %vm568_vm4 = vcmp.gt.f32.partialorder %v566_v61, 0.0 }
 0x347   :  { %v575_v63 = vsel %vm567_vm3, %v565_v49, %v742_v60 }
 0x348   :  { %744 = vmatmul.msk.f32.vlgmr.msrb.gmra.mxu2 %vm43_vm0, %v575_v63  ;;  %825 = vpow2.f32 %v571_v62 }
 0x34e   :  { %v826_v0 = vpop.eup %825 }
 0x34f   :  { %v743_v1 = vadd.f32 -1.0, %v826_v0 }
 0x351   :  { %v576_v28 = vsel %vm568_vm4, %v566_v61, %v743_v1 }
 0x352   :  { %745 = vmatmul.msk.f32.gmra.mxu2 %vm43_vm0, %v576_v28 }
 0x3cb   :  { %v604_v2 = vpop.f32.mrf.mxu2 }
 0x3cc   :  { %652 = vperm.xlu2 %789, %v604_v2   ;;  %612 = vrot.lane.b32.xlu0 %v604_v2, %s892_s11 }
 0x3d5   :  { %v607_v3 = vpop.f32.mrf.mxu2 }
 0x3d6   :  { %614 = vrot.lane.b32.xlu1 %v607_v3, %s892_s11  ;;  %746 = vmatpush.msk.msrb.mxu3 %vm690_vm5, %v607_v3 }
 0x3d8   :  { %708 = vmatpush.msrb.mxu3 %v604_v2 }
 0x426   :  { %v653_v8 = vpop.permute.xlu2 %652 }
 0x43e   :  { %v613_v4 = vpop.permute.xlu0 %612 }
 0x43f   :  { %618 = vxpose.xlu0.b32.start [1/2] (short) (narrow) %v613_v4, 8 }
 0x448   :  { %v615_v5 = vpop.permute.xlu1 %614 }
 0x449   :  { %619 = vxpose.xlu0.b32.end [2/2] (short) (narrow) %v615_v5, 8 }
 0x4b0   :  { %790 = vset.pattern.permute.xlu0 %v896_v36 }
 0x4e5   :  { %v634_v6 = vpop.trf.xlu0 }
 0x4e6   :  { %v655_v7 = vperm.slane %v634_v6, 0 }
 0x4e8   :  { %v656_v9 = vadd.f32 %v655_v7, %v653_v8 }
 0x4ea   :  { %v658_v10 = vmul.f32 0.01, %v656_v9  ;;  %vm657_vm0 = vcmp.gt.f32.partialorder %v656_v9, 0.0 }
 0x4ec   :  { %v659_v14 = vsel %vm657_vm0, %v656_v9, %v658_v10 }
 0x4ed   :  { %v660_v11 = vadd.f32 %v659_v14, %v650_v13 }
 0x4ef   :  { %v662_v15 = vsel %vm661_vm6, %v660_v11, -inf }
 0x4f0   :  { %663 = vmax.xlane.f32.xlu1 %v662_v15 }
 0x563   :  { %v664_v16 = vpop.xlane.xlu1 %663 }
 0x564   :  { %v665_v17 = vsub.f32 %v660_v11, %v664_v16 }
 0x566   :  { %v666_v18 = vmul.f32 1.442695, %v665_v17 }
 0x568   :  { %827 = vpow2.f32 %v666_v18 }
 0x56e   :  { %v828_v19 = vpop.eup %827 }
 0x56f   :  { %747 = vmatmul.msk.f32.vlgmr.msrb.gmra.mxu3 %vm661_vm6, %v828_v19  ;;  %v668_v20 = vsel %vm661_vm6, %v828_v19, 0.0 }
 0x570   :  { %669 = vadd.xlane.f32.xlu2 %v668_v20 }
 0x5e3   :  { %v670_v21 = vpop.xlane.xlu2 %669 }
 0x5e4   :  { %v671_v22 = vmax.f32 %v670_v21, 1e-30 }
 0x5e6   :  { %829 = vrcp.f32 %v671_v22  ;;  %v683_v25 = vand.u32 2147483648, %v671_v22  ;;  %v681_v27 = vand.u32 2147483647, %v671_v22  ;;  %vm677_vm8 = vweird.f32 %v671_v22 }
 0x5e8   :  { %v684_v30 = vor.u32 1.1754944e-38, %v683_v25  ;;  %vm682_vm10 = vcmp.eq.f32.partialorder %v681_v27, 8.507059e+37 }
 0x5ec   :  { %v830_v12 = vpop.eup %829 }
 0x5ed   :  { %v673_v23 = vmul.f32 %v830_v12, %v671_v22  ;;  %vm678_vm7 = vweird.f32 %v830_v12 }
 0x5ee   :  { %vm679_vm9 = vmor %vm677_vm8, %vm678_vm7 }
 0x5ef   :  { %v674_v24 = vsub.f32 1.0, %v673_v23 }
 0x5f1   :  { %v675_v26 = vmul.f32 %v830_v12, %v674_v24 }
 0x5f2   :  { %v710_v33 = vpop.f32.mrf.mxu3 }
 0x5f3   :  { %v676_v29 = vadd.f32 %v830_v12, %v675_v26 }
 0x5f5   :  { %v680_v31 = vsel %vm679_vm9, %v830_v12, %v676_v29 }
 0x5f6   :  { %v685_v32 = vsel %vm682_vm10, %v684_v30, %v680_v31 }
 0x5f7   :  { %v713_v34 = vmul.f32 %v710_v33, %v685_v32 }
 0x5f9   :  { %714 = vst.msk [vmem:[#allocation5] sm:$0xff] %vm134_vm2, %v713_v34 }
 0x5fa   :  { %725 = dma.vmem_to_hbm [thread:$0]  %s721_s24, 128, %s723_s27, [#allocation4]  }
 0x5fb   :  { %881 = dma.done.wait [#allocation4], 128  }
 0x5fc   :  { %882 = vsyncadd [#allocation4], 4294967168 }
 0x5fd   :  { %730 = vsyncpa [#allocation3], 1 }
 0x5fe   :  { %731 = vsyncpa [#allocation4], 1 }

</bundles_post_ra>
